<compile_context>
chip_gen: v5e
topology: v5e:2x2
jax: 0.10.0
libtpu: 0.0.40
codegen_flags: <defaults>
</compile_context>

<pallas_src>
import math

import jax
import jax.numpy as jnp
from jax.experimental import pallas as pl
from jax.experimental.pallas import tpu as pltpu


def _attn_kernel(qkv_ref, mask_ref, o_ref):
    # qkv_ref: (3, Bblk, S, D) f32 ; mask_ref: (S, S) f32 ; o_ref: (Bblk, S, D) f32
    d = qkv_ref.shape[-1]
    scale = 1.0 / math.sqrt(d)

    # Fold 1/sqrt(d) into q (S*D elems, not S*S scores) and hand the MXU bf16
    # operands; accumulation stays f32 via preferred_element_type.
    q = (qkv_ref[0] * scale).astype(jnp.bfloat16)   # (Bblk, S, D)
    k = qkv_ref[1].astype(jnp.bfloat16)             # (Bblk, S, D)
    v = qkv_ref[2].astype(jnp.bfloat16)             # (Bblk, S, D)
    m = mask_ref[...]                               # (S, S), broadcasts over batch

    # scores = (q/sqrt(d)) @ k^T + mask; contraction on the last dim of both
    # operands (same form as the reference flash-attention kernel -> no
    # materialized transpose of k).
    scores = jnp.einsum("bqd,bkd->bqk", q, k,
                        preferred_element_type=jnp.float32)
    scores = scores + m

    # Numerically-stable softmax along the last axis, all f32 on the VPU.
    scores = scores - jnp.max(scores, axis=-1, keepdims=True)
    p = jnp.exp(scores)
    denom = jnp.sum(p, axis=-1, keepdims=True)
    attn = (p * pl.reciprocal(denom, approx=True)).astype(jnp.bfloat16)  # EUP vrcp

    o_ref[...] = jnp.einsum("bqk,bkd->bqd", attn, v,
                            preferred_element_type=jnp.float32
                            ).astype(o_ref.dtype)
    # TODO(synk): with a single head (D=32 < 128 lanes) the output store is a
    # masked partial-lane store; if heads existed they should be fused so the
    # output minor dim is >=128.


def _dual_tensorcore_chip() -> bool:
    """True on chips with 2 TensorCores per chip (v7x) -> shard batch across cores."""
    try:
        kind = jax.devices()[0].device_kind.lower()
    except Exception:
        return False
    return "v7" in kind or "7x" in kind


def attention(q, k, v, mask):
    """q, k, v: (B, S, D) f32; mask: (1, S, S) f32 additive mask."""
    B, S, D = q.shape

    # One input slab -> a single input DMA descriptor instead of three.
    qkv = jnp.stack([q, k, v], axis=0)              # (3, B, S, D)

    flops = 2 * B * (2 * S * S * D)                 # two matmuls per batch elem
    transcendentals = B * S * S                     # exp in softmax
    bytes_accessed = 4 * (3 * B * S * D + S * S + B * S * D)
    cost = pl.CostEstimate(flops=flops, transcendentals=transcendentals,
                           bytes_accessed=bytes_accessed)

    use_batch_grid = _dual_tensorcore_chip() and B > 1

    if use_batch_grid:
        # v7x: one batch element per TensorCore via a parallel grid axis.
        in_specs = [
            pl.BlockSpec((3, 1, S, D), lambda b: (0, b, 0, 0)),
            pl.BlockSpec((pl.Squeezed(), S, S), lambda b: (0, 0, 0)),
        ]
        out_specs = pl.BlockSpec((1, S, D), lambda b: (b, 0, 0))
        call_kwargs = dict(
            grid=(B,),
            compiler_params=pltpu.CompilerParams(
                dimension_semantics=("parallel",)),
        )
    else:
        # v5e/v6e: single TensorCore -> a grid would just be a serial loop
        # (~0.35 us/step overhead). Keep the whole ~70 KiB problem resident.
        in_specs = [
            pl.BlockSpec((3, B, S, D), lambda: (0, 0, 0, 0)),
            pl.BlockSpec((pl.Squeezed(), S, S), lambda: (0, 0, 0)),
        ]
        out_specs = pl.BlockSpec((B, S, D), lambda: (0, 0, 0))
        call_kwargs = {}

    return pl.pallas_call(
        _attn_kernel,
        out_shape=jax.ShapeDtypeStruct((B, S, D), jnp.float32),
        in_specs=in_specs,
        out_specs=out_specs,
        cost_estimate=cost,
        **call_kwargs,
    )(qkv, mask)


def reference(q, k, v, mask):
    d = q.shape[-1]
    qk = jnp.einsum("bsd,btd->bst", q, k) / math.sqrt(d)
    qk = qk + mask
    attn = jax.nn.softmax(qk, axis=-1)
    return jnp.einsum("bst,btd->bsd", attn, v)


if __name__ == "__main__":
    B, S, D = 2, 56, 32

    key = jax.random.PRNGKey(0)
    kq, kk, kv, km = jax.random.split(key, 4)
    q = jax.random.normal(kq, (B, S, D), dtype=jnp.float32)
    k = jax.random.normal(kk, (B, S, D), dtype=jnp.float32)  # module-global `k`
    v = jax.random.normal(kv, (B, S, D), dtype=jnp.float32)

    # The original builds `(torch.rand(1,56,56) > 0.7).fill_(-1e9)`, whose fill_
    # makes a degenerate uniform mask (softmax cancels it, leaving the QK path
    # untested).  Use the evidently-intended sparse additive mask (-1e9 where
    # rand > 0.7, else 0) so softmax and both matmuls are actually exercised.
    mask = jnp.where(jax.random.uniform(km, (1, S, S)) > 0.7,
                     -1000000000.0, 0.0).astype(jnp.float32)

    out = attention(q, k, v, mask)
    jax.block_until_ready(out)

    ref = reference(q, k, v, mask)
    assert out.shape == (B, S, D)
    # Tolerance covers bf16 MXU operands (f32 accumulation) plus the approx
    # (EUP) reciprocal in the softmax denominator.
    assert jnp.allclose(out, ref, atol=1e-2, rtol=1e-2)

    print("KERNEL_OK")
</pallas_src>

<mosaic_0001>
module attributes {stable_mosaic.version = 11 : i64} {
  func.func @_attn_kernel(%arg0: memref<3x2x56x32xf32, #tpu.memory_space<vmem>>, %arg1: memref<1x56x56xf32, #tpu.memory_space<vmem>>, %arg2: memref<2x56x32xf32, #tpu.memory_space<vmem>>) attributes {dimension_semantics = [], scalar_prefetch = 0 : i64, scratch_operands = 0 : i64, tpu.core_type = #tpu.core_type<tc>} {
    %c0 = arith.constant 0 : index
    %c0_0 = arith.constant 0 : index
    %c0_1 = arith.constant 0 : index
    %c0_2 = arith.constant 0 : index
    %0 = vector.load %arg0[%c0, %c0_0, %c0_1, %c0_2] : memref<3x2x56x32xf32, #tpu.memory_space<vmem>>, vector<1x2x56x32xf32>
    %1 = vector.shape_cast %0 : vector<1x2x56x32xf32> to vector<2x56x32xf32>
    %cst = arith.constant 0.176776692 : f32
    %2 = vector.broadcast %cst : f32 to vector<2x56x32xf32>
    %3 = arith.mulf %1, %2 : vector<2x56x32xf32>
    %4 = arith.truncf %3 : vector<2x56x32xf32> to vector<2x56x32xbf16>
    %c1 = arith.constant 1 : index
    %c0_3 = arith.constant 0 : index
    %c0_4 = arith.constant 0 : index
    %c0_5 = arith.constant 0 : index
    %5 = vector.load %arg0[%c1, %c0_3, %c0_4, %c0_5] : memref<3x2x56x32xf32, #tpu.memory_space<vmem>>, vector<1x2x56x32xf32>
    %6 = vector.shape_cast %5 : vector<1x2x56x32xf32> to vector<2x56x32xf32>
    %7 = arith.truncf %6 : vector<2x56x32xf32> to vector<2x56x32xbf16>
    %c2 = arith.constant 2 : index
    %c0_6 = arith.constant 0 : index
    %c0_7 = arith.constant 0 : index
    %c0_8 = arith.constant 0 : index
    %8 = vector.load %arg0[%c2, %c0_6, %c0_7, %c0_8] : memref<3x2x56x32xf32, #tpu.memory_space<vmem>>, vector<1x2x56x32xf32>
    %9 = vector.shape_cast %8 : vector<1x2x56x32xf32> to vector<2x56x32xf32>
    %10 = arith.truncf %9 : vector<2x56x32xf32> to vector<2x56x32xbf16>
    %c0_9 = arith.constant 0 : index
    %c0_10 = arith.constant 0 : index
    %c0_11 = arith.constant 0 : index
    %11 = vector.load %arg1[%c0_9, %c0_10, %c0_11] : memref<1x56x56xf32, #tpu.memory_space<vmem>>, vector<1x56x56xf32>
    %12 = vector.shape_cast %11 : vector<1x56x56xf32> to vector<56x56xf32>
    "tpu.trace_start"() <{level = 10 : i32, message = "bqd,bkd->bqk"}> : () -> ()
    %cst_12 = arith.constant dense<0.000000e+00> : vector<2x56x56xf32>
    %13 = tpu.matmul %4, %7, %cst_12 {dimension_numbers = #tpu.dot_dimension_numbers<[2], [2], [1], [1], [0, 0, 0, 1, 1, 1], [0], [0]>} : vector<2x56x32xbf16>, vector<2x56x32xbf16>, vector<2x56x56xf32> -> vector<2x56x56xf32>
    "tpu.trace_stop"() : () -> ()
    %14 = vector.shape_cast %12 : vector<56x56xf32> to vector<1x56x56xf32>
    %15 = vector.broadcast %14 : vector<1x56x56xf32> to vector<2x56x56xf32>
    %16 = arith.addf %13, %15 : vector<2x56x56xf32>
    %cst_13 = arith.constant dense<0xFF800000> : vector<2x56xf32>
    %17 = vector.multi_reduction <maximumf>, %16, %cst_13 [2] : vector<2x56x56xf32> to vector<2x56xf32>
    %18 = vector.shape_cast %17 : vector<2x56xf32> to vector<2x56x1xf32>
    %19 = vector.broadcast %18 : vector<2x56x1xf32> to vector<2x56x56xf32>
    %20 = arith.subf %16, %19 : vector<2x56x56xf32>
    %21 = math.exp %20 : vector<2x56x56xf32>
    %cst_14 = arith.constant dense<0.000000e+00> : vector<2x56xf32>
    %22 = vector.multi_reduction <add>, %21, %cst_14 [2] : vector<2x56x56xf32> to vector<2x56xf32>
    %23 = vector.shape_cast %22 : vector<2x56xf32> to vector<2x56x1xf32>
    %24 = tpu.reciprocal %23 {approx = true} : vector<2x56x1xf32> -> vector<2x56x1xf32>
    %25 = vector.broadcast %24 : vector<2x56x1xf32> to vector<2x56x56xf32>
    %26 = arith.mulf %21, %25 : vector<2x56x56xf32>
    %27 = arith.truncf %26 : vector<2x56x56xf32> to vector<2x56x56xbf16>
    "tpu.trace_start"() <{level = 10 : i32, message = "bqk,bkd->bqd"}> : () -> ()
    %cst_15 = arith.constant dense<0.000000e+00> : vector<2x56x32xf32>
    %28 = tpu.matmul %27, %10, %cst_15 {dimension_numbers = #tpu.dot_dimension_numbers<[2], [1], [1], [2], [0, 0, 0, 1, 1, 2], [0], [0]>} : vector<2x56x56xbf16>, vector<2x56x32xbf16>, vector<2x56x32xf32> -> vector<2x56x32xf32>
    "tpu.trace_stop"() : () -> ()
    %c0_16 = arith.constant 0 : index
    %c0_17 = arith.constant 0 : index
    %c0_18 = arith.constant 0 : index
    %29 = vector.load %arg2[%c0_16, %c0_17, %c0_18] : memref<2x56x32xf32, #tpu.memory_space<vmem>>, vector<2x56x32xf32>
    tpu.vector_store %arg2[%c0_16, %c0_17, %c0_18], %28 {strides = array<i32>} : memref<2x56x32xf32, #tpu.memory_space<vmem>>, vector<2x56x32xf32>,
    return
  }
}

</mosaic_0001>

<bundles_post_ra>
// kernel: tpu_custom_call.1
= control target key start
LH: loop header
LB: loop body
LE: loop exit
PB: predicated region body
PF: predicated region fallthrough
CT: control target
= control target key end

     0   :  { %vm155_vm0 = vcmask 261120   ;;  %vm296_vm1 = vcmask 457728   ;;  %vm516_vm2 = vcmask 1043456   ;;  %s1130_s0 = inlined_call_operand.vmem [shape: f32[3,2,56,32], index: 0, kind: input, shape index: {}]   ;;  %s1131_s1 = inlined_call_operand.vmem [shape: f32[1,56,56], index: 1, kind: input, shape index: {}]   ;;  %s1132_s2 = inlined_call_operand.vmem [shape: f32[2,56,32], index: 2, kind: output, shape index: {}]  }
   0x1   :  { %v654_v0 = vld [vmem:[%s1130_s0 + $0xa0] sm:$0xff]  ;;  %v661_v1 = vld [vmem:[%s1130_s0 + $0xd8] sm:$0xff]  ;;  %v652_v2 = vld [vmem:[%s1130_s0 + $0x90] sm:$0xff] }
   0x2   :  { %v75_v3 = vpack.c.bf16 %v654_v0, %v654_v0  ;;  %v82_v4 = vpack.c.bf16 %v661_v1, %v661_v1  ;;  %v653_v5 = vld [vmem:[%s1130_s0 + $0x98] sm:$0xff]  ;;  %v73_v6 = vpack.c.bf16 %v652_v2, %v652_v2  ;;  %v659_v7 = vld [vmem:[%s1130_s0 + $0xc8] sm:$0xff]  ;;  %v660_v8 = vld [vmem:[%s1130_s0 + $0xd0] sm:$0xff] }
   0x3   :  { %v74_v9 = vpack.c.bf16 %v653_v5, %v653_v5  ;;  %v80_v10 = vpack.c.bf16 %v659_v7, %v659_v7  ;;  %v81_v11 = vpack.c.bf16 %v660_v8, %v660_v8  ;;  %v650_v20 = vld [vmem:[%s1130_s0 + $0x80] sm:$0xff]  ;;  %v651_v21 = vld [vmem:[%s1130_s0 + $0x88] sm:$0xff]  ;;  %v657_v22 = vld [vmem:[%s1130_s0 + $0xb8] sm:$0xff] }
   0x4   :  { %v150_v12 = vunpack.c.l.b16 %v75_v3  ;;  %v239_v13 = vunpack.c.l.b16 %v82_v4  ;;  %v148_v14 = vunpack.c.l.b16 %v73_v6  ;;  %v658_v23 = vld [vmem:[%s1130_s0 + $0xc0] sm:$0xff]  ;;  %v71_v26 = vpack.c.bf16 %v650_v20, %v650_v20  ;;  %v648_v38 = vld [vmem:[%s1130_s0 + $0x70] sm:$0xff]  ;;  %v649_v39 = vld [vmem:[%s1130_s0 + $0x78] sm:$0xff] }
   0x5   :  { %v149_v15 = vunpack.c.l.b16 %v74_v9  ;;  %v237_v18 = vunpack.c.l.b16 %v80_v10  ;;  %v238_v19 = vunpack.c.l.b16 %v81_v11  ;;  %v72_v27 = vpack.c.bf16 %v651_v21, %v651_v21  ;;  %v655_v40 = vld [vmem:[%s1130_s0 + $0xa8] sm:$0xff]  ;;  %v656_v41 = vld [vmem:[%s1130_s0 + $0xb0] sm:$0xff]  ;;  %v12_v48 = vld [vmem:[%s1130_s0] sm:$0xff] }
   0x6   :  { %v154_v16 = vpack.c.b16 %v150_v12, %v150_v12  ;;  %v243_v17 = vpack.c.b16 %v239_v13, %v239_v13  ;;  %v78_v30 = vpack.c.bf16 %v657_v22, %v657_v22  ;;  %v79_v31 = vpack.c.bf16 %v658_v23, %v658_v23  ;;  %v13_v51 = vld [vmem:[%s1130_s0 + $0x8] sm:$0xff]  ;;  %v19_v52 = vld [vmem:[%s1130_s0 + $0x38] sm:$0xff]  ;;  %v20_v53 = vld [vmem:[%s1130_s0 + $0x40] sm:$0xff] }
   0x7   :  { %v153_v28 = vpack.c.b16 %v149_v15, %v148_v14  ;;  %v242_v29 = vpack.c.b16 %v238_v19, %v237_v18  ;;  %v146_v32 = vunpack.c.l.b16 %v71_v26  ;;  %v147_v33 = vunpack.c.l.b16 %v72_v27  ;;  %v14_v12 = vld [vmem:[%s1130_s0 + $0x10] sm:$0xff]  ;;  %v15_v13 = vld [vmem:[%s1130_s0 + $0x18] sm:$0xff]  ;;  %v21_v14 = vld [vmem:[%s1130_s0 + $0x48] sm:$0xff] }
   0x8   :  { %v178_v24 = vsel %vm155_vm0, %v154_v16, 0  ;;  %v266_v25 = vsel %vm155_vm0, %v243_v17, 0  ;;  %v235_v36 = vunpack.c.l.b16 %v78_v30  ;;  %v236_v37 = vunpack.c.l.b16 %v79_v31  ;;  %v22_v15 = vld [vmem:[%s1130_s0 + $0x50] sm:$0xff]  ;;  %v16_v30 = vld [vmem:[%s1130_s0 + $0x20] sm:$0xff]  ;;  %v17_v31 = vld [vmem:[%s1130_s0 + $0x28] sm:$0xff] }
   0x9   :  { %184 = vmatpush.bf16.xpose.msra.mxu0 %v178_v24  ;;  %272 = vmatpush.bf16.xpose.msra.mxu1 %v266_v25  ;;  %v175_v34 = vsel %vm155_vm0, %v153_v28, 0  ;;  %v263_v35 = vsel %vm155_vm0, %v242_v29, 0  ;;  %v152_v42 = vpack.c.b16 %v147_v33, %v146_v32  ;;  %v69_v43 = vpack.c.bf16 %v648_v38, %v648_v38  ;;  %v23_v32 = vld [vmem:[%s1130_s0 + $0x58] sm:$0xff]  ;;  %v24_v33 = vld [vmem:[%s1130_s0 + $0x60] sm:$0xff] }
   0xa   :  { %v241_v44 = vpack.c.b16 %v236_v37, %v235_v36  ;;  %v70_v45 = vpack.c.bf16 %v649_v39, %v649_v39  ;;  %v76_v46 = vpack.c.bf16 %v655_v40, %v655_v40  ;;  %v77_v47 = vpack.c.bf16 %v656_v41, %v656_v41 }
   0xb   :  { %v172_v49 = vsel %vm155_vm0, %v152_v42, 0  ;;  %v144_v50 = vunpack.c.l.b16 %v69_v43  ;;  %v26_v58 = vmul.f32 0.17677669, %v12_v48  ;;  %v27_v59 = vmul.f32 0.17677669, %v13_v51  ;;  %v18_v48 = vld [vmem:[%s1130_s0 + $0x30] sm:$0xff] }
   0xc   :  { %v260_v54 = vsel %vm155_vm0, %v241_v44, 0  ;;  %v145_v55 = vunpack.c.l.b16 %v70_v45  ;;  %v233_v56 = vunpack.c.l.b16 %v76_v46  ;;  %v234_v57 = vunpack.c.l.b16 %v77_v47 }
   0xd   :  { %v33_v60 = vmul.f32 0.17677669, %v19_v52  ;;  %v34_v61 = vmul.f32 0.17677669, %v20_v53  ;;  %v40_v0 = vpack.c.bf16 %v26_v58, %v26_v58  ;;  %v41_v1 = vpack.c.bf16 %v27_v59, %v27_v59  ;;  %v112_v58 = vld [vmem:[%s1131_s1] sm:$0xff] }
   0xe   :  { %v151_v62 = vpack.c.b16 %v145_v55, %v144_v50  ;;  %v240_v63 = vpack.c.b16 %v234_v57, %v233_v56  ;;  %v28_v16 = vmul.f32 0.17677669, %v14_v12  ;;  %v29_v17 = vmul.f32 0.17677669, %v15_v13 }
   0xf   :  { %v47_v2 = vpack.c.bf16 %v33_v60, %v33_v60  ;;  %v48_v3 = vpack.c.bf16 %v34_v61, %v34_v61  ;;  %v126_v6 = vunpack.c.l.b16 %v40_v0  ;;  %v127_v7 = vunpack.c.l.b16 %v41_v1  ;;  %v113_v1 = vld [vmem:[%s1131_s1 + $0x8] sm:$0xff] }
  0x10   :  { %v169_v4 = vsel %vm155_vm0, %v151_v62, 0  ;;  %v257_v5 = vsel %vm155_vm0, %v240_v63, 0  ;;  %v35_v18 = vmul.f32 0.17677669, %v21_v14  ;;  %v36_v19 = vmul.f32 0.17677669, %v22_v15 }
  0x11   :  { %185 = vmatpush.bf16.xpose.msra.mxu0 %v175_v34  ;;  %273 = vmatpush.bf16.xpose.msra.mxu1 %v263_v35  ;;  %v215_v8 = vunpack.c.l.b16 %v47_v2  ;;  %v216_v9 = vunpack.c.l.b16 %v48_v3  ;;  %v133_v10 = vpack.c.b16 %v127_v7, %v126_v6  ;;  %v42_v20 = vpack.c.bf16 %v28_v16, %v28_v16  ;;  %v115_v15 = vld [vmem:[%s1131_s1 + $0x18] sm:$0xff] }
  0x12   :  { %v43_v21 = vpack.c.bf16 %v29_v17, %v29_v17  ;;  %v49_v22 = vpack.c.bf16 %v35_v18, %v35_v18  ;;  %v50_v23 = vpack.c.bf16 %v36_v19, %v36_v19  ;;  %v30_v34 = vmul.f32 0.17677669, %v16_v30 }
  0x13   :  { %v222_v11 = vpack.c.b16 %v216_v9, %v215_v8  ;;  %v128_v24 = vunpack.c.l.b16 %v42_v20  ;;  %v31_v35 = vmul.f32 0.17677669, %v17_v31  ;;  %v37_v36 = vmul.f32 0.17677669, %v23_v32  ;;  %v114_v8 = vld [vmem:[%s1131_s1 + $0x10] sm:$0xff] }
  0x14   :  { %v129_v25 = vunpack.c.l.b16 %v43_v21  ;;  %v217_v26 = vunpack.c.l.b16 %v49_v22  ;;  %v218_v27 = vunpack.c.l.b16 %v50_v23  ;;  %v38_v37 = vmul.f32 0.17677669, %v24_v33  ;;  %v116_v22 = vld [vmem:[%s1131_s1 + $0x20] sm:$0xff] }
  0x15   :  { %v44_v38 = vpack.c.bf16 %v30_v34, %v30_v34  ;;  %v45_v39 = vpack.c.bf16 %v31_v35, %v31_v35  ;;  %v51_v40 = vpack.c.bf16 %v37_v36, %v37_v36  ;;  %v32_v50 = vmul.f32 0.17677669, %v18_v48  ;;  %v118_v36 = vld [vmem:[%s1131_s1 + $0x30] sm:$0xff] }
  0x16   :  { %v134_v28 = vpack.c.b16 %v129_v25, %v128_v24  ;;  %v223_v29 = vpack.c.b16 %v218_v27, %v217_v26  ;;  %v52_v41 = vpack.c.bf16 %v38_v37, %v38_v37 }
  0x17   :  { %v130_v42 = vunpack.c.l.b16 %v44_v38  ;;  %v131_v43 = vunpack.c.l.b16 %v45_v39  ;;  %v219_v44 = vunpack.c.l.b16 %v51_v40  ;;  %v46_v52 = vpack.c.bf16 %v32_v50, %v32_v50 }
  0x18   :  { %v220_v45 = vunpack.c.l.b16 %v52_v41 }
  0x19   :  { %186 = vmatpush.bf16.xpose.msra.mxu0 %v172_v49  ;;  %274 = vmatpush.bf16.xpose.msra.mxu1 %v260_v54  ;;  %v135_v46 = vpack.c.b16 %v131_v43, %v130_v42  ;;  %v25_v49 = vld [vmem:[%s1130_s0 + $0x68] sm:$0xff]  ;;  %v132_v54 = vunpack.c.l.b16 %v46_v52 }
  0x1a   :  { %v224_v47 = vpack.c.b16 %v220_v45, %v219_v44  ;;  %v39_v51 = vmul.f32 0.17677669, %v25_v49 }
  0x1b   :  { %v136_v56 = vpack.c.b16 %v132_v54, %v132_v54 }
  0x1c   :  { %v53_v53 = vpack.c.bf16 %v39_v51, %v39_v51 }
  0x1e   :  { %v221_v55 = vunpack.c.l.b16 %v53_v53 }
  0x20   :  { %v225_v57 = vpack.c.b16 %v221_v55, %v221_v55 }
  0x21   :  { %187 = vmatpush.bf16.xpose.msra.mxu0 %v169_v4  ;;  %275 = vmatpush.bf16.xpose.msra.mxu1 %v257_v5 }
  0x28   :  { %676 = vmatmul.msk.bf16.vlgmr.msra.gmra.mxu0 %vm155_vm0, %v133_v10  ;;  %680 = vmatmul.msk.bf16.vlgmr.msra.gmra.mxu1 %vm155_vm0, %v222_v11 }
  0x38   :  { %677 = vmatmul.msk.bf16.gmra.mxu0 %vm155_vm0, %v134_v28  ;;  %681 = vmatmul.msk.bf16.gmra.mxu1 %vm155_vm0, %v223_v29  ;;  %v117_v29 = vld [vmem:[%s1131_s1 + $0x28] sm:$0xff] }
  0x48   :  { %678 = vmatmul.msk.bf16.gmra.mxu0 %vm155_vm0, %v135_v46  ;;  %682 = vmatmul.msk.bf16.gmra.mxu1 %vm155_vm0, %v224_v47 }
  0x58   :  { %679 = vmatmul.msk.bf16.gmra.mxu0 %vm155_vm0, %v136_v56  ;;  %683 = vmatmul.msk.bf16.gmra.mxu1 %vm155_vm0, %v225_v57 }
  0xa5   :  { %v189_v59 = vpop.f32.mrf.mxu0  ;;  %v277_v60 = vpop.f32.mrf.mxu1 }
  0xa6   :  { %v866_v61 = vadd.f32 %v189_v59, %v112_v58  ;;  %v868_v62 = vadd.f32 %v277_v60, %v112_v58 }
  0xa8   :  { %v318_v63 = vsel %vm296_vm1, %v868_v62, -inf  ;;  %v297_v0 = vsel %vm296_vm1, %v866_v61, -inf }
  0xa9   :  { %319 = vmax.xlane.f32.xlu1 %v318_v63  ;;  %298 = vmax.xlane.f32.xlu0 %v297_v0 }
  0xad   :  { %v191_v2 = vpop.f32.mrf.mxu0  ;;  %v279_v3 = vpop.f32.mrf.mxu1 }
  0xae   :  { %v877_v4 = vadd.f32 %v191_v2, %v113_v1  ;;  %v879_v5 = vadd.f32 %v279_v3, %v113_v1 }
  0xb0   :  { %v321_v6 = vsel %vm296_vm1, %v879_v5, -inf  ;;  %v300_v7 = vsel %vm296_vm1, %v877_v4, -inf }
  0xb1   :  { %322 = vmax.xlane.f32.xlu1 %v321_v6  ;;  %301 = vmax.xlane.f32.xlu0 %v300_v7 }
  0xb5   :  { %v194_v9 = vpop.f32.mrf.mxu0  ;;  %v282_v10 = vpop.f32.mrf.mxu1 }
  0xb6   :  { %v888_v11 = vadd.f32 %v194_v9, %v114_v8  ;;  %v890_v12 = vadd.f32 %v282_v10, %v114_v8 }
  0xb8   :  { %v303_v13 = vsel %vm296_vm1, %v888_v11, -inf  ;;  %v324_v14 = vsel %vm296_vm1, %v890_v12, -inf }
  0xb9   :  { %304 = vmax.xlane.f32.xlu2 %v303_v13  ;;  %325 = vmax.xlane.f32.xlu0 %v324_v14 }
  0xbd   :  { %v196_v16 = vpop.f32.mrf.mxu0  ;;  %v284_v17 = vpop.f32.mrf.mxu1 }
  0xbe   :  { %v899_v18 = vadd.f32 %v196_v16, %v115_v15  ;;  %v901_v19 = vadd.f32 %v284_v17, %v115_v15 }
  0xc0   :  { %v327_v20 = vsel %vm296_vm1, %v901_v19, -inf  ;;  %v306_v21 = vsel %vm296_vm1, %v899_v18, -inf }
  0xc1   :  { %328 = vmax.xlane.f32.xlu1 %v327_v20  ;;  %307 = vmax.xlane.f32.xlu2 %v306_v21 }
  0xc5   :  { %v199_v23 = vpop.f32.mrf.mxu0  ;;  %v287_v24 = vpop.f32.mrf.mxu1 }
  0xc6   :  { %v910_v25 = vadd.f32 %v199_v23, %v116_v22  ;;  %v912_v26 = vadd.f32 %v287_v24, %v116_v22 }
  0xc8   :  { %v330_v27 = vsel %vm296_vm1, %v912_v26, -inf  ;;  %v309_v28 = vsel %vm296_vm1, %v910_v25, -inf }
  0xc9   :  { %331 = vmax.xlane.f32.xlu1 %v330_v27  ;;  %310 = vmax.xlane.f32.xlu2 %v309_v28 }
  0xcd   :  { %v201_v30 = vpop.f32.mrf.mxu0  ;;  %v289_v31 = vpop.f32.mrf.mxu1 }
  0xce   :  { %v921_v32 = vadd.f32 %v201_v30, %v117_v29  ;;  %v923_v33 = vadd.f32 %v289_v31, %v117_v29 }
  0xd0   :  { %v333_v34 = vsel %vm296_vm1, %v923_v33, -inf  ;;  %v312_v35 = vsel %vm296_vm1, %v921_v32, -inf }
  0xd1   :  { %334 = vmax.xlane.f32.xlu2 %v333_v34  ;;  %313 = vmax.xlane.f32.xlu0 %v312_v35 }
  0xd5   :  { %v204_v37 = vpop.f32.mrf.mxu0  ;;  %v292_v38 = vpop.f32.mrf.mxu1 }
  0xd6   :  { %v932_v39 = vadd.f32 %v204_v37, %v118_v36  ;;  %v934_v40 = vadd.f32 %v292_v38, %v118_v36 }
  0xd8   :  { %v336_v41 = vsel %vm296_vm1, %v934_v40, -inf  ;;  %v315_v42 = vsel %vm296_vm1, %v932_v39, -inf }
  0xd9   :  { %337 = vmax.xlane.f32.xlu1 %v336_v41  ;;  %316 = vmax.xlane.f32.xlu0 %v315_v42 }
  0xdd   :  { %v206_v43 = vpop.f32.mrf.mxu0  ;;  %v294_v44 = vpop.f32.mrf.mxu1 }
 0x11c   :  { %v320_v45 = vpop.xlane.xlu1 %319  ;;  %v299_v46 = vpop.xlane.xlu0 %298 }
 0x11d   :  { %v346_v47 = vsub.f32 %v868_v62, %v320_v45  ;;  %v339_v48 = vsub.f32 %v866_v61, %v299_v46 }
 0x11f   :  { %v367_v49 = vmul.f32 1.442695, %v346_v47  ;;  %v353_v50 = vmul.f32 1.442695, %v339_v48 }
 0x121   :  { %692 = vpow2.f32 %v367_v49 }
 0x122   :  { %694 = vpow2.f32 %v353_v50 }
 0x124   :  { %v323_v51 = vpop.xlane.xlu1 %322  ;;  %v302_v52 = vpop.xlane.xlu0 %301 }
 0x125   :  { %v347_v53 = vsub.f32 %v879_v5, %v323_v51  ;;  %v340_v54 = vsub.f32 %v877_v4, %v302_v52  ;;  %v668_v51 = vld [vmem:[%s1130_s0 + $0x110] sm:$0xff]  ;;  %v675_v52 = vld [vmem:[%s1130_s0 + $0x148] sm:$0xff] }
 0x127   :  { %v944_v55 = vpop.eup %692  ;;  %v369_v56 = vmul.f32 1.442695, %v347_v53  ;;  %v355_v57 = vmul.f32 1.442695, %v340_v54  ;;  %v104_v53 = vpack.c.bf16 %v668_v51, %v668_v51  ;;  %v111_v54 = vpack.c.bf16 %v675_v52, %v675_v52 }
 0x128   :  { %v946_v58 = vpop.eup %694  ;;  %v402_v59 = vsel %vm296_vm1, %v944_v55, 0.0 }
 0x129   :  { %696 = vpow2.f32 %v369_v56  ;;  %403 = vadd.xlane.f32.xlu1 %v402_v59  ;;  %v381_v60 = vsel %vm296_vm1, %v946_v58, 0.0  ;;  %v496_v56 = vunpack.c.l.b16 %v104_v53 }
 0x12a   :  { %698 = vpow2.f32 %v355_v57  ;;  %382 = vadd.xlane.f32.xlu2 %v381_v60  ;;  %v579_v57 = vunpack.c.l.b16 %v111_v54 }
 0x12b   :  { %v500_v59 = vpack.c.b16 %v496_v56, %v496_v56 }
 0x12c   :  { %v305_v61 = vpop.xlane.xlu2 %304  ;;  %v326_v62 = vpop.xlane.xlu0 %325  ;;  %v583_v60 = vpack.c.b16 %v579_v57, %v579_v57 }
 0x12d   :  { %v341_v63 = vsub.f32 %v888_v11, %v305_v61  ;;  %v348_v0 = vsub.f32 %v890_v12, %v326_v62  ;;  %v666_v61 = vld [vmem:[%s1130_s0 + $0x100] sm:$0xff]  ;;  %v667_v62 = vld [vmem:[%s1130_s0 + $0x108] sm:$0xff] }
 0x12f   :  { %v954_v1 = vpop.eup %696  ;;  %v357_v2 = vmul.f32 1.442695, %v341_v63  ;;  %v371_v3 = vmul.f32 1.442695, %v348_v0  ;;  %v673_v63 = vld [vmem:[%s1130_s0 + $0x138] sm:$0xff]  ;;  %v102_v0 = vpack.c.bf16 %v666_v61, %v666_v61 }
 0x130   :  { %v956_v4 = vpop.eup %698  ;;  %v405_v5 = vsel %vm296_vm1, %v954_v1, 0.0 }
 0x131   :  { %700 = vpow2.f32 %v357_v2  ;;  %v384_v6 = vsel %vm296_vm1, %v956_v4, 0.0  ;;  %v103_v2 = vpack.c.bf16 %v667_v62, %v667_v62 }
 0x132   :  { %702 = vpow2.f32 %v371_v3  ;;  %406 = vadd.xlane.f32.xlu2 %v405_v5  ;;  %385 = vadd.xlane.f32.xlu0 %v384_v6  ;;  %v674_v3 = vld [vmem:[%s1130_s0 + $0x140] sm:$0xff]  ;;  %v109_v5 = vpack.c.bf16 %v673_v63, %v673_v63  ;;  %v518_v6 = vsel %vm516_vm2, %v500_v59, 0 }
 0x133   :  { %524 = vmatpush.bf16.msra.mxu2 %v518_v6 }
 0x134   :  { %v329_v7 = vpop.xlane.xlu1 %328  ;;  %v308_v8 = vpop.xlane.xlu2 %307 }
 0x135   :  { %v349_v9 = vsub.f32 %v901_v19, %v329_v7  ;;  %v342_v10 = vsub.f32 %v899_v18, %v308_v8  ;;  %v600_v7 = vsel %vm516_vm2, %v583_v60, 0  ;;  %v110_v8 = vpack.c.bf16 %v674_v3, %v674_v3 }
 0x136   :  { %606 = vmatpush.bf16.msra.mxu3 %v600_v7 }
 0x137   :  { %v964_v11 = vpop.eup %700  ;;  %v373_v12 = vmul.f32 1.442695, %v349_v9  ;;  %v359_v13 = vmul.f32 1.442695, %v342_v10  ;;  %v494_v9 = vunpack.c.l.b16 %v102_v0  ;;  %v495_v10 = vunpack.c.l.b16 %v103_v2 }
 0x138   :  { %v966_v14 = vpop.eup %702  ;;  %v387_v15 = vsel %vm296_vm1, %v964_v11, 0.0 }
 0x139   :  { %704 = vpow2.f32 %v373_v12  ;;  %v408_v16 = vsel %vm296_vm1, %v966_v14, 0.0  ;;  %v577_v12 = vunpack.c.l.b16 %v109_v5 }
 0x13a   :  { %706 = vpow2.f32 %v359_v13  ;;  %388 = vadd.xlane.f32.xlu0 %v387_v15  ;;  %409 = vadd.xlane.f32.xlu2 %v408_v16  ;;  %v578_v13 = vunpack.c.l.b16 %v110_v8  ;;  %v664_v15 = vld [vmem:[%s1130_s0 + $0xf0] sm:$0xff]  ;;  %v665_v16 = vld [vmem:[%s1130_s0 + $0xf8] sm:$0xff] }
 0x13c   :  { %v332_v17 = vpop.xlane.xlu1 %331  ;;  %v311_v19 = vpop.xlane.xlu2 %310 }
 0x13d   :  { %v350_v18 = vsub.f32 %v912_v26, %v332_v17  ;;  %v343_v20 = vsub.f32 %v910_v25, %v311_v19  ;;  %v671_v17 = vld [vmem:[%s1130_s0 + $0x128] sm:$0xff]  ;;  %v499_v19 = vpack.c.b16 %v495_v10, %v494_v9 }
 0x13f   :  { %v974_v21 = vpop.eup %704  ;;  %v375_v22 = vmul.f32 1.442695, %v350_v18  ;;  %v361_v23 = vmul.f32 1.442695, %v343_v20  ;;  %v100_v18 = vpack.c.bf16 %v664_v15, %v664_v15  ;;  %v101_v20 = vpack.c.bf16 %v665_v16, %v665_v16  ;;  %525 = vmatpush.bf16.msra.mxu2 %v499_v19 }
 0x140   :  { %v976_v24 = vpop.eup %706  ;;  %v411_v27 = vsel %vm296_vm1, %v974_v21, 0.0 }
 0x141   :  { %708 = vpow2.f32 %v375_v22  ;;  %v390_v28 = vsel %vm296_vm1, %v976_v24, 0.0  ;;  %v672_v22 = vld [vmem:[%s1130_s0 + $0x130] sm:$0xff] }
 0x142   :  { %710 = vpow2.f32 %v361_v23  ;;  %391 = vadd.xlane.f32.xlu1 %v390_v28  ;;  %412 = vadd.xlane.f32.xlu0 %v411_v27  ;;  %v107_v23 = vpack.c.bf16 %v671_v17, %v671_v17  ;;  %v582_v27 = vpack.c.b16 %v578_v13, %v577_v12  ;;  %v108_v28 = vpack.c.bf16 %v672_v22, %v672_v22 }
 0x144   :  { %v335_v29 = vpop.xlane.xlu2 %334  ;;  %v314_v26 = vpop.xlane.xlu0 %313  ;;  %607 = vmatpush.bf16.msra.mxu3 %v582_v27 }
 0x145   :  { %v351_v25 = vsub.f32 %v923_v33, %v335_v29  ;;  %v344_v30 = vsub.f32 %v921_v32, %v314_v26  ;;  %v492_v29 = vunpack.c.l.b16 %v100_v18  ;;  %v493_v26 = vunpack.c.l.b16 %v101_v20 }
 0x147   :  { %v984_v31 = vpop.eup %708  ;;  %v377_v34 = vmul.f32 1.442695, %v351_v25  ;;  %v363_v35 = vmul.f32 1.442695, %v344_v30  ;;  %v575_v25 = vunpack.c.l.b16 %v107_v23  ;;  %v576_v30 = vunpack.c.l.b16 %v108_v28 }
 0x148   :  { %v986_v36 = vpop.eup %710  ;;  %v414_v37 = vsel %vm296_vm1, %v984_v31, 0.0 }
 0x149   :  { %712 = vpow2.f32 %v377_v34  ;;  %v393_v38 = vsel %vm296_vm1, %v986_v36, 0.0  ;;  %v662_v34 = vld [vmem:[%s1130_s0 + $0xe0] sm:$0xff] }
 0x14a   :  { %714 = vpow2.f32 %v363_v35  ;;  %394 = vadd.xlane.f32.xlu1 %v393_v38  ;;  %415 = vadd.xlane.f32.xlu0 %v414_v37  ;;  %v663_v35 = vld [vmem:[%s1130_s0 + $0xe8] sm:$0xff]  ;;  %v669_v37 = vld [vmem:[%s1130_s0 + $0x118] sm:$0xff]  ;;  %v498_v38 = vpack.c.b16 %v493_v26, %v492_v29 }
 0x14c   :  { %v338_v41 = vpop.xlane.xlu1 %337  ;;  %v317_v33 = vpop.xlane.xlu0 %316  ;;  %526 = vmatpush.bf16.msra.mxu2 %v498_v38 }
 0x14d   :  { %v352_v32 = vsub.f32 %v934_v40, %v338_v41  ;;  %v345_v42 = vsub.f32 %v932_v39, %v317_v33  ;;  %v98_v41 = vpack.c.bf16 %v662_v34, %v662_v34  ;;  %v99_v33 = vpack.c.bf16 %v663_v35, %v663_v35 }
 0x14f   :  { %v994_v43 = vpop.eup %712  ;;  %v379_v44 = vmul.f32 1.442695, %v352_v32  ;;  %v365_v45 = vmul.f32 1.442695, %v345_v42  ;;  %v670_v32 = vld [vmem:[%s1130_s0 + $0x120] sm:$0xff]  ;;  %v105_v42 = vpack.c.bf16 %v669_v37, %v669_v37 }
 0x150   :  { %v996_v46 = vpop.eup %714  ;;  %v417_v47 = vsel %vm296_vm1, %v994_v43, 0.0 }
 0x151   :  { %716 = vpow2.f32 %v379_v44  ;;  %v396_v48 = vsel %vm296_vm1, %v996_v46, 0.0  ;;  %v581_v44 = vpack.c.b16 %v576_v30, %v575_v25 }
 0x152   :  { %718 = vpow2.f32 %v365_v45  ;;  %418 = vadd.xlane.f32.xlu1 %v417_v47  ;;  %397 = vadd.xlane.f32.xlu2 %v396_v48  ;;  %v106_v45 = vpack.c.bf16 %v670_v32, %v670_v32  ;;  %v490_v47 = vunpack.c.l.b16 %v98_v41  ;;  %v491_v48 = vunpack.c.l.b16 %v99_v33 }
 0x153   :  { %608 = vmatpush.bf16.msra.mxu3 %v581_v44 }
 0x154   :  { %v497_v51 = vpack.c.b16 %v491_v48, %v490_v47 }
 0x156   :  { %527 = vmatpush.bf16.msra.mxu2 %v497_v51 }
 0x157   :  { %v1002_v49 = vpop.eup %716 }
 0x158   :  { %v1004_v40 = vpop.eup %718  ;;  %v420_v39 = vsel %vm296_vm1, %v1002_v49, 0.0 }
 0x159   :  { %421 = vadd.xlane.f32.xlu0 %v420_v39  ;;  %v399_v50 = vsel %vm296_vm1, %v1004_v40, 0.0  ;;  %v573_v39 = vunpack.c.l.b16 %v105_v42 }
 0x15a   :  { %400 = vadd.xlane.f32.xlu2 %v399_v50  ;;  %v574_v50 = vunpack.c.l.b16 %v106_v45 }
 0x15c   :  { %v580_v52 = vpack.c.b16 %v574_v50, %v573_v39 }
 0x15e   :  { %609 = vmatpush.bf16.msra.mxu3 %v580_v52 }
 0x19c   :  { %v404_v53 = vpop.xlane.xlu1 %403 }
 0x19d   :  { %v383_v54 = vpop.xlane.xlu2 %382  ;;  %720 = vrcp.f32 %v404_v53 }
 0x19e   :  { %722 = vrcp.f32 %v383_v54 }
 0x1a3   :  { %v721_v59 = vpop.eup %720 }
 0x1a4   :  { %v723_v60 = vpop.eup %722  ;;  %v444_v61 = vmul.f32 %v721_v59, %v944_v55 }
 0x1a5   :  { %v407_v56 = vpop.xlane.xlu2 %406  ;;  %v386_v57 = vpop.xlane.xlu0 %385  ;;  %v437_v62 = vmul.f32 %v723_v60, %v946_v58 }
 0x1a6   :  { %724 = vrcp.f32 %v407_v56  ;;  %v458_v5 = vpack.c.bf16 %v444_v61, %v444_v61 }
 0x1a7   :  { %726 = vrcp.f32 %v386_v57  ;;  %v451_v8 = vpack.c.bf16 %v437_v62, %v437_v62 }
 0x1a8   :  { %v555_v12 = vunpack.c.l.b16 %v458_v5 }
 0x1a9   :  { %v472_v15 = vunpack.c.l.b16 %v451_v8 }
 0x1ac   :  { %v725_v63 = vpop.eup %724 }
 0x1ad   :  { %v727_v0 = vpop.eup %726  ;;  %v389_v2 = vpop.xlane.xlu0 %388  ;;  %v445_v3 = vmul.f32 %v725_v63, %v954_v1 }
 0x1ae   :  { %v410_v6 = vpop.xlane.xlu2 %409  ;;  %v438_v7 = vmul.f32 %v727_v0, %v956_v4  ;;  %728 = vrcp.f32 %v389_v2 }
 0x1af   :  { %v459_v9 = vpack.c.bf16 %v445_v3, %v445_v3  ;;  %730 = vrcp.f32 %v410_v6 }
 0x1b0   :  { %v452_v10 = vpack.c.bf16 %v438_v7, %v438_v7 }
 0x1b1   :  { %v556_v13 = vunpack.c.l.b16 %v459_v9 }
 0x1b2   :  { %v473_v55 = vunpack.c.l.b16 %v452_v10 }
 0x1b3   :  { %v562_v16 = vpack.c.b16 %v556_v13, %v555_v12 }
 0x1b4   :  { %v479_v58 = vpack.c.b16 %v473_v55, %v472_v15  ;;  %v729_v1 = vpop.eup %728 }
 0x1b5   :  { %v392_v17 = vpop.xlane.xlu1 %391  ;;  %688 = vmatmul.msk.bf16.vlgmr.msra.gmra.mxu3 %vm296_vm1, %v562_v16  ;;  %v413_v19 = vpop.xlane.xlu0 %412  ;;  %v439_v18 = vmul.f32 %v729_v1, %v964_v11 }
 0x1b6   :  { %732 = vrcp.f32 %v392_v17  ;;  %684 = vmatmul.msk.bf16.vlgmr.msra.gmra.mxu2 %vm296_vm1, %v479_v58  ;;  %v731_v4 = vpop.eup %730 }
 0x1b7   :  { %734 = vrcp.f32 %v413_v19  ;;  %v446_v20 = vmul.f32 %v731_v4, %v966_v14  ;;  %v453_v26 = vpack.c.bf16 %v439_v18, %v439_v18 }
 0x1b9   :  { %v460_v30 = vpack.c.bf16 %v446_v20, %v446_v20  ;;  %v474_v37 = vunpack.c.l.b16 %v453_v26 }
 0x1bb   :  { %v557_v41 = vunpack.c.l.b16 %v460_v30 }
 0x1bc   :  { %v733_v22 = vpop.eup %732 }
 0x1bd   :  { %v735_v23 = vpop.eup %734  ;;  %v395_v27 = vpop.xlane.xlu1 %394  ;;  %v440_v29 = vmul.f32 %v733_v22, %v976_v24 }
 0x1be   :  { %v416_v28 = vpop.xlane.xlu0 %415  ;;  %v447_v25 = vmul.f32 %v735_v23, %v974_v21 }
 0x1bf   :  { %v454_v34 = vpack.c.bf16 %v440_v29, %v440_v29  ;;  %736 = vrcp.f32 %v416_v28 }
 0x1c0   :  { %v461_v35 = vpack.c.bf16 %v447_v25, %v447_v25  ;;  %738 = vrcp.f32 %v395_v27 }
 0x1c1   :  { %v475_v38 = vunpack.c.l.b16 %v454_v34 }
 0x1c2   :  { %v558_v11 = vunpack.c.l.b16 %v461_v35 }
 0x1c3   :  { %v480_v33 = vpack.c.b16 %v475_v38, %v474_v37 }
 0x1c4   :  { %v563_v14 = vpack.c.b16 %v558_v11, %v557_v41 }
 0x1c5   :  { %v419_v32 = vpop.xlane.xlu1 %418  ;;  %v398_v42 = vpop.xlane.xlu2 %397 }
 0x1c6   :  { %v737_v44 = vpop.eup %736  ;;  %740 = vrcp.f32 %v419_v32  ;;  %685 = vmatmul.msk.bf16.gmra.mxu2 %vm296_vm1, %v480_v33  ;;  %689 = vmatmul.msk.bf16.gmra.mxu3 %vm296_vm1, %v563_v14 }
 0x1c7   :  { %v739_v21 = vpop.eup %738  ;;  %742 = vrcp.f32 %v398_v42  ;;  %v448_v24 = vmul.f32 %v737_v44, %v984_v31 }
 0x1c8   :  { %v441_v45 = vmul.f32 %v739_v21, %v986_v36 }
 0x1c9   :  { %v462_v52 = vpack.c.bf16 %v448_v24, %v448_v24 }
 0x1ca   :  { %v455_v54 = vpack.c.bf16 %v441_v45, %v441_v45 }
 0x1cb   :  { %v559_v59 = vunpack.c.l.b16 %v462_v52 }
 0x1cc   :  { %v741_v47 = vpop.eup %740  ;;  %v422_v48 = vpop.xlane.xlu0 %421  ;;  %v476_v61 = vunpack.c.l.b16 %v455_v54 }
 0x1cd   :  { %v743_v39 = vpop.eup %742  ;;  %v449_v50 = vmul.f32 %v741_v47, %v994_v43  ;;  %v401_v51 = vpop.xlane.xlu2 %400  ;;  %744 = vrcp.f32 %v422_v48 }
 0x1ce   :  { %v442_v53 = vmul.f32 %v743_v39, %v996_v46  ;;  %746 = vrcp.f32 %v401_v51 }
 0x1cf   :  { %v463_v56 = vpack.c.bf16 %v449_v50, %v449_v50 }
 0x1d0   :  { %v456_v57 = vpack.c.bf16 %v442_v53, %v442_v53 }
 0x1d1   :  { %v560_v60 = vunpack.c.l.b16 %v463_v56 }
 0x1d2   :  { %v477_v31 = vunpack.c.l.b16 %v456_v57 }
 0x1d3   :  { %v564_v62 = vpack.c.b16 %v560_v60, %v559_v59  ;;  %v745_v36 = vpop.eup %744 }
 0x1d4   :  { %v481_v63 = vpack.c.b16 %v477_v31, %v476_v61  ;;  %v747_v0 = vpop.eup %746  ;;  %v450_v46 = vmul.f32 %v745_v36, %v1002_v49 }
 0x1d5   :  { %v443_v43 = vmul.f32 %v747_v0, %v1004_v40 }
 0x1d6   :  { %686 = vmatmul.msk.bf16.gmra.mxu2 %vm296_vm1, %v481_v63  ;;  %690 = vmatmul.msk.bf16.gmra.mxu3 %vm296_vm1, %v564_v62  ;;  %v464_v3 = vpack.c.bf16 %v450_v46, %v450_v46 }
 0x1d7   :  { %v457_v2 = vpack.c.bf16 %v443_v43, %v443_v43 }
 0x1d8   :  { %v561_v6 = vunpack.c.l.b16 %v464_v3 }
 0x1d9   :  { %v478_v5 = vunpack.c.l.b16 %v457_v2 }
 0x1da   :  { %v565_v8 = vpack.c.b16 %v561_v6, %v561_v6 }
 0x1db   :  { %v482_v7 = vpack.c.b16 %v478_v5, %v478_v5 }
 0x1e6   :  { %687 = vmatmul.msk.bf16.gmra.mxu2 %vm296_vm1, %v482_v7  ;;  %691 = vmatmul.msk.bf16.gmra.mxu3 %vm296_vm1, %v565_v8 }
 0x238   :  { %v611_v9 = vpop.f32.mrf.mxu3 }
 0x239   :  { %v529_v10 = vpop.f32.mrf.mxu2  ;;  %637 = vst.msk [vmem:[%s1132_s2 + $0x38] sm:$0xff] %vm155_vm0, %v611_v9 }
 0x23a   :  { %630 = vst.msk [vmem:[%s1132_s2] sm:$0xff] %vm155_vm0, %v529_v10 }
 0x240   :  { %v613_v49 = vpop.f32.mrf.mxu3 }
 0x241   :  { %v531_v40 = vpop.f32.mrf.mxu2  ;;  %638 = vst.msk [vmem:[%s1132_s2 + $0x40] sm:$0xff] %vm155_vm0, %v613_v49 }
 0x242   :  { %631 = vst.msk [vmem:[%s1132_s2 + $0x8] sm:$0xff] %vm155_vm0, %v531_v40 }
 0x249   :  { %v534_v12 = vpop.f32.mrf.mxu2  ;;  %v616_v13 = vpop.f32.mrf.mxu3 }
 0x24a   :  { %632 = vst.msk [vmem:[%s1132_s2 + $0x10] sm:$0xff] %vm155_vm0, %v534_v12 }
 0x24b   :  { %639 = vst.msk [vmem:[%s1132_s2 + $0x48] sm:$0xff] %vm155_vm0, %v616_v13 }
 0x251   :  { %v536_v15 = vpop.f32.mrf.mxu2  ;;  %v618_v55 = vpop.f32.mrf.mxu3 }
 0x252   :  { %633 = vst.msk [vmem:[%s1132_s2 + $0x18] sm:$0xff] %vm155_vm0, %v536_v15 }
 0x253   :  { %640 = vst.msk [vmem:[%s1132_s2 + $0x50] sm:$0xff] %vm155_vm0, %v618_v55 }
 0x259   :  { %v539_v16 = vpop.f32.mrf.mxu2  ;;  %v621_v58 = vpop.f32.mrf.mxu3 }
 0x25a   :  { %634 = vst.msk [vmem:[%s1132_s2 + $0x20] sm:$0xff] %vm155_vm0, %v539_v16 }
 0x25b   :  { %641 = vst.msk [vmem:[%s1132_s2 + $0x58] sm:$0xff] %vm155_vm0, %v621_v58 }
 0x261   :  { %v541_v17 = vpop.f32.mrf.mxu2  ;;  %v623_v19 = vpop.f32.mrf.mxu3 }
 0x262   :  { %635 = vst.msk [vmem:[%s1132_s2 + $0x28] sm:$0xff] %vm155_vm0, %v541_v17 }
 0x263   :  { %642 = vst.msk [vmem:[%s1132_s2 + $0x60] sm:$0xff] %vm155_vm0, %v623_v19 }
 0x269   :  { %v544_v1 = vpop.f32.mrf.mxu2  ;;  %v626_v4 = vpop.f32.mrf.mxu3 }
 0x26a   :  { %636 = vst.msk [vmem:[%s1132_s2 + $0x30] sm:$0xff] %vm155_vm0, %v544_v1 }
 0x26b   :  { %643 = vst.msk [vmem:[%s1132_s2 + $0x68] sm:$0xff] %vm155_vm0, %v626_v4 }
 0x271   :  { %v546_v18 = vpop.f32.mrf.mxu2  ;;  %v628_v20 = vpop.f32.mrf.mxu3 }

</bundles_post_ra>
